<compile_context>
chip_gen: v5e
topology: v5e:2x2
jax: 0.10.0
libtpu: 0.0.40
codegen_flags: <defaults>
</compile_context>

<pallas_src>
import math

import jax
import jax.numpy as jnp
import numpy as np
from jax.experimental import pallas as pl
from jax.experimental.pallas import tpu as pltpu


def _round_up(x, m):
    return ((x + m - 1) // m) * m


# ---------------------------------------------------------------------------
# Pallas kernel: tiled matmul  out[b, n] = sum_k x[b, k] * M[k, n]
# (all of S2Convolution's structure -- psi, the e3nn Linear gather and both
#  normalizations -- is folded into the constant operator M at module init)
# ---------------------------------------------------------------------------
def _s2conv_matmul_kernel(x_ref, m_ref, o_ref, acc_ref):
    @pl.when(pl.program_id(2) == 0)
    def _init():
        acc_ref[...] = jnp.zeros_like(acc_ref)

    acc_ref[...] += jnp.dot(x_ref[...], m_ref[...],
                            preferred_element_type=jnp.float32)

    @pl.when(pl.program_id(2) == pl.num_programs(2) - 1)
    def _store():
        o_ref[...] = acc_ref[...].astype(o_ref.dtype)


# ---------------------------------------------------------------------------
# Init-time constants + wrapper
# ---------------------------------------------------------------------------
def _so3_linear_index_tables(lmax):
    """e3nn o3.Linear(s2_irreps -> so3_irreps) path structure.

    For flattened so3 output index j = off_l + w*(2l+1) + m:
      im_idx[j] = l^2 + m   (which input coefficient feeds j)
      iw_idx[j] = l^2 + w   (which psi coefficient weights j)
    """
    im, iw = [], []
    for l in range(lmax + 1):
        d = 2 * l + 1
        for wm in range(d):
            for m in range(d):
                iw.append(l * l + wm)
                im.append(l * l + m)
    return np.asarray(im, np.int32), np.asarray(iw, np.int32)


def make_s2_convolution(w, y_basis, lmax, *, compute_dtype=jnp.float32):
    """Module-init: fold psi + e3nn Linear into one operator, return jitted forward."""
    f_in, f_out, n_grid = w.shape
    d_in = (lmax + 1) ** 2
    im_idx, iw_idx = _so3_linear_index_tables(lmax)
    d_out = int(im_idx.shape[0])
    d_pad = _round_up(d_out, 128)            # lane-dense output width

    # --- init-time fold: psi and the full Linear path become one constant
    #     operator M[(x,i),(y,j)] = psi[x,y,iw_idx[j]] * [i==im_idx[j]] / sqrt(f_in)
    # TODO(synk): if w must stay a live training parameter, recompute M per step
    # (e.g. a tiny separate pallas_call) instead of folding it here.
    psi = np.einsum("ni,xyn->xyi",
                    np.asarray(y_basis, np.float32),
                    np.asarray(w, np.float32)) / math.sqrt(n_grid)
    m_op = np.zeros((f_in, d_in, f_out, d_pad), np.float32)
    xs = np.arange(f_in)[:, None, None]
    ys = np.arange(f_out)[None, :, None]
    js = np.arange(d_out)[None, None, :]
    m_op[xs, im_idx[js], ys, js] = psi[xs, ys, iw_idx[js]] / math.sqrt(f_in)
    m_op = jnp.asarray(m_op.reshape(f_in * d_in, f_out * d_pad), compute_dtype)

    k_dim = f_in * d_in
    n_dim = f_out * d_pad
    in_bytes = np.dtype(compute_dtype).itemsize

    # --- tile sizes: full dim or a multiple of (8,128) so every block is legal
    tn = n_dim if n_dim <= 512 else next(t for t in (512, 256, 128) if n_dim % t == 0)
    tk = k_dim if k_dim <= 2048 else next(
        (t for t in (1024, 512, 256, 128) if k_dim % t == 0), k_dim)

    def forward(x):
        batch = x.shape[0]
        tb = batch if batch <= 256 else next(
            (t for t in (256, 128, 64, 32, 16, 8) if batch % t == 0), batch)
        x2 = x.reshape(batch, k_dim).astype(compute_dtype)
        grid = (batch // tb, n_dim // tn, k_dim // tk)

        # double-buffered input blocks + double-buffered out block + f32 acc
        vmem_bytes = (2 * (tb * tk + tk * tn) * in_bytes + 3 * tb * tn * 4)
        # NOTE: v7x has 64 MiB VMEM per TC -- if 2*vmem_bytes approaches that,
        # shrink tn/tk rather than raising the limit further.
        vmem_limit = int(min(max(2 * vmem_bytes, 16 << 20), 64 << 20))

        cost = pl.CostEstimate(
            flops=2 * batch * k_dim * n_dim,
            transcendentals=0,
            bytes_accessed=(batch * k_dim + k_dim * n_dim) * in_bytes
                           + batch * n_dim * 4)

        out2 = pl.pallas_call(
            _s2conv_matmul_kernel,
            out_shape=jax.ShapeDtypeStruct((batch, n_dim), jnp.float32),
            grid=grid,
            in_specs=[
                pl.BlockSpec((tb, tk), lambda i, j, k: (i, k)),
                pl.BlockSpec((tk, tn), lambda i, j, k: (k, j)),
            ],
            out_specs=pl.BlockSpec((tb, tn), lambda i, j, k: (i, j)),
            scratch_shapes=[pltpu.VMEM((tb, tn), jnp.float32)],
            compiler_params=pltpu.CompilerParams(
                dimension_semantics=("parallel", "parallel", "arbitrary"),
                vmem_limit_bytes=vmem_limit),
            cost_estimate=cost,
        )(x2, m_op)

        # keep the lane-dense padded layout for downstream TPU layers; padded
        # columns of M are zero so out[..., d_out:] is exactly zero.
        return out2.reshape(batch, f_out, d_pad)

    return jax.jit(forward), d_out, d_pad


# ---------------------------------------------------------------------------
# Pure-JAX reference (same math, for self-check)
# ---------------------------------------------------------------------------
def s2_convolution_ref(x, w, y_basis, lmax):
    f_in, f_out, n_grid = w.shape
    psi = jnp.einsum("ni,xyn->xyi", y_basis, w) / math.sqrt(n_grid)
    outs = []
    for l in range(lmax + 1):
        d = 2 * l + 1
        sl = slice(l * l, l * l + d)
        o = jnp.einsum("xyw,bxm->bywm", psi[:, :, sl], x[:, :, sl]) / math.sqrt(f_in)
        outs.append(o.reshape(x.shape[0], f_out, d * d))
    return jnp.concatenate(outs, axis=-1)


# ---------------------------------------------------------------------------
if __name__ == "__main__":
    F_IN, F_OUT, LMAX, N_GRID, BATCH = 4, 8, 3, 24, 2
    D_IN = (LMAX + 1) ** 2                                   # s2_irreps dim  = 16
    D_OUT = sum((2 * l + 1) ** 2 for l in range(LMAX + 1))   # so3_irreps dim = 84

    key = jax.random.PRNGKey(0)
    k_w, k_y, k_x = jax.random.split(key, 3)

    # parameter: torch.randn(f_in, f_out, kernel_grid.shape[1])
    w = jax.random.normal(k_w, (F_IN, F_OUT, N_GRID), jnp.float32)
    # buffer Y: in the real module this is o3.spherical_harmonics_alpha_beta(kernel_grid).
    # TODO(synk): synthesized deterministically with the correct shape instead of
    # evaluating real spherical harmonics (no e3nn dependency in-script).
    y_basis = jax.random.normal(k_y, (N_GRID, D_IN), jnp.float32)
    # input: (batch, f_in, s2_irreps.dim)
    x = jax.random.normal(k_x, (BATCH, F_IN, D_IN), jnp.float32)

    ref = s2_convolution_ref(x, w, y_basis, LMAX)

    # f32 MXU path -- tight check
    conv_f32, d_out, d_pad = make_s2_convolution(w, y_basis, LMAX,
                                                 compute_dtype=jnp.float32)
    out = jax.block_until_ready(conv_f32(x))
    assert out.shape == (BATCH, F_OUT, d_pad)
    np.testing.assert_allclose(np.asarray(out[..., :d_out]), np.asarray(ref),
                               rtol=1e-4, atol=1e-4)
    assert not np.any(np.asarray(out[..., d_out:]))          # padded lanes stay zero

    # bf16-operand MXU path (f32 accumulate) -- looser tolerance
    conv_bf16, _, _ = make_s2_convolution(w, y_basis, LMAX,
                                          compute_dtype=jnp.bfloat16)
    out_bf16 = jax.block_until_ready(conv_bf16(x))
    np.testing.assert_allclose(np.asarray(out_bf16[..., :d_out]), np.asarray(ref),
                               rtol=5e-2, atol=1e-1)

    print("KERNEL_OK")
</pallas_src>

<mosaic_0001>
module attributes {stable_mosaic.version = 11 : i64} {
  func.func @_s2conv_matmul_kernel(%arg0: i32, %arg1: i32, %arg2: i32, %arg3: memref<2x64xf32, #tpu.memory_space<vmem>>, %arg4: memref<64x512xf32, #tpu.memory_space<vmem>>, %arg5: memref<2x512xf32, #tpu.memory_space<vmem>>, %arg6: memref<2x512xf32, #tpu.memory_space<vmem>>) attributes {dimension_semantics = [#tpu.dimension_semantics<parallel>, #tpu.dimension_semantics<parallel>, #tpu.dimension_semantics<arbitrary>], iteration_bounds = array<i64: 1, 2, 1>, scalar_prefetch = 0 : i64, scratch_operands = 1 : i64, tpu.core_type = #tpu.core_type<tc>, window_params = [{transform_indices = @transform_0, window_bounds = array<i64: 2, 64>}, {transform_indices = @transform_1, window_bounds = array<i64: 64, 512>}, {transform_indices = @transform_2, window_bounds = array<i64: 2, 512>}]} {
    %c0_i32 = arith.constant 0 : i32
    %0 = arith.cmpi eq, %arg2, %c0_i32 : i32
    %1 = arith.extui %0 : i1 to i32
    %c0_i32_0 = arith.constant 0 : i32
    %2 = arith.cmpi ne, %1, %c0_i32_0 : i32
    scf.if %2 {
      %cst_10 = arith.constant 0.000000e+00 : f32
      %12 = vector.broadcast %cst_10 : f32 to vector<2x512xf32>
      %c0_11 = arith.constant 0 : index
      %c0_12 = arith.constant 0 : index
      %13 = vector.load %arg6[%c0_11, %c0_12] : memref<2x512xf32, #tpu.memory_space<vmem>>, vector<2x512xf32>
      tpu.vector_store %arg6[%c0_11, %c0_12], %12 {strides = array<i32>} : memref<2x512xf32, #tpu.memory_space<vmem>>, vector<2x512xf32>,
    } else {
    }
    %c0 = arith.constant 0 : index
    %c0_1 = arith.constant 0 : index
    %3 = vector.load %arg6[%c0, %c0_1] : memref<2x512xf32, #tpu.memory_space<vmem>>, vector<2x512xf32>
    %c0_2 = arith.constant 0 : index
    %c0_3 = arith.constant 0 : index
    %4 = vector.load %arg3[%c0_2, %c0_3] : memref<2x64xf32, #tpu.memory_space<vmem>>, vector<2x64xf32>
    %c0_4 = arith.constant 0 : index
    %c0_5 = arith.constant 0 : index
    %5 = vector.load %arg4[%c0_4, %c0_5] : memref<64x512xf32, #tpu.memory_space<vmem>>, vector<64x512xf32>
    %cst = arith.constant dense<0.000000e+00> : vector<2x512xf32>
    %6 = tpu.matmul %4, %5, %cst {dimension_numbers = #tpu.dot_dimension_numbers<[1], [0], [0], [1], [0, 0, 1, 1], [], []>} : vector<2x64xf32>, vector<64x512xf32>, vector<2x512xf32> -> vector<2x512xf32>
    %7 = arith.addf %3, %6 : vector<2x512xf32>
    %c0_6 = arith.constant 0 : index
    %c0_7 = arith.constant 0 : index
    %8 = vector.load %arg6[%c0_6, %c0_7] : memref<2x512xf32, #tpu.memory_space<vmem>>, vector<2x512xf32>
    tpu.vector_store %arg6[%c0_6, %c0_7], %7 {strides = array<i32>} : memref<2x512xf32, #tpu.memory_space<vmem>>, vector<2x512xf32>,
    %c0_i32_8 = arith.constant 0 : i32
    %9 = arith.cmpi eq, %arg2, %c0_i32_8 : i32
    %10 = arith.extui %9 : i1 to i32
    %c0_i32_9 = arith.constant 0 : i32
    %11 = arith.cmpi ne, %10, %c0_i32_9 : i32
    scf.if %11 {
      %c0_10 = arith.constant 0 : index
      %c0_11 = arith.constant 0 : index
      %12 = vector.load %arg6[%c0_10, %c0_11] : memref<2x512xf32, #tpu.memory_space<vmem>>, vector<2x512xf32>
      %c0_12 = arith.constant 0 : index
      %c0_13 = arith.constant 0 : index
      %13 = vector.load %arg5[%c0_12, %c0_13] : memref<2x512xf32, #tpu.memory_space<vmem>>, vector<2x512xf32>
      tpu.vector_store %arg5[%c0_12, %c0_13], %12 {strides = array<i32>} : memref<2x512xf32, #tpu.memory_space<vmem>>, vector<2x512xf32>,
    } else {
    }
    return
  }
  func.func @transform_0(%arg0: i32, %arg1: i32, %arg2: i32) -> (i32, i32) {
    %c0_i32 = arith.constant 0 : i32
    return %arg0, %arg2 : i32, i32
  }
  func.func @transform_1(%arg0: i32, %arg1: i32, %arg2: i32) -> (i32, i32) {
    %c0_i32 = arith.constant 0 : i32
    return %arg2, %arg1 : i32, i32
  }
  func.func @transform_2(%arg0: i32, %arg1: i32, %arg2: i32) -> (i32, i32) {
    %c0_i32 = arith.constant 0 : i32
    return %arg0, %arg1 : i32, i32
  }
}

</mosaic_0001>

<bundles_post_ra>
// kernel: forward.1
= control target key start
LH: loop header
LB: loop body
LE: loop exit
PB: predicated region body
PF: predicated region fallthrough
CT: control target
= control target key end

     0   :  { %7 = vsyncpa [#allocation4], 0  ;;  %s796_s0 = inlined_call_operand.vmem [shape: f32[2,64], index: 0, kind: input, shape index: {}]   ;;  %s797_s1 = inlined_call_operand.hbm [shape: f32[64,1024], index: 1, kind: input, shape index: {}]   ;;  %s798_s2 = inlined_call_operand.vmem [shape: f32[2,1024], index: 2, kind: output, shape index: {}]  }
   0x1   :  { %9 = vsyncpa [#allocation4 + $0x1], 0  ;;  %s668_s9 = smov 0   ;;  %s670_s10 = smov 0  }
   0x2   :  { %s672_s11 = smov 0   ;;  %s674_s12 = smov 0  }
   0x3   :  { %s676_s13 = smov 0   ;;  %s678_s14 = smov 0  }
   0x4 LB: > { %s491_s15 = sadd.s32 4294967295, %s648_s14   ;;  %s30_s16 = sadd.s32 1, %s644_s13  ;;  %s648_s14 = sphi %s678_s14, %s15_s14   ;;  %s644_s13 = sphi %s676_s13, %s805_s13   ;;  %s640_s12 = sphi %s674_s12, %s804_s12   ;;  %s636_s11 = sphi %s672_s11, %s803_s11   ;;  %s632_s10 = sphi %s670_s10, %s802_s10   ;;  %s628_s9 = sphi %s668_s9, %s801_s9  }
   0x5   : > { %p32_p0 = scmp.ge.s32.totalorder %s30_s16, 2  ;;  %s71_s17 = sadd.s32 1, %s636_s11 }
   0x6   : > { %p78_p1 = scmp.ne.s32.totalorder %s636_s11, %s632_s10  ;;  %p79_p2 = scmp.eq.s32.totalorder %s648_s14, 0 }
   0x7   : > { %s807_s16 = smov (%p32_p0, %s30_s16), 0  ;;  %p84_p4 = scmp.ne.s32.totalorder %s632_s10, %s628_s9 }
   0x8   : > { %p704_p3 = por %p79_p2, %p78_p1  ;;  %s67_s19 = ssub.s32 %s644_s13, %s807_s16 }
   0x9   : > { %p85_p5 = scmp.eq.s32.totalorder %s491_s15, 0  ;;  %p69_p6 = scmp.eq.s32.totalorder %s67_s19, 0 }
   0xa   : > { %p516_p8 = scmp.lt.s32.totalorder %s648_s14, 2  ;;  %s146_s22 = sand.u32 1, %s636_s11  }
   0xb   : > { %p711_p7 = por %p85_p5, %p84_p4  ;;  %s509_s23 = sshll.u32 %s644_s13, 5 }
   0xc   : > { %s717_s21 = scalar_select %p69_p6, %s636_s11, %s71_s17  }
   0xd   : > { %s496_s24 = sshll.u32 %s146_s22, 8  ;;  %s158_s27 = scalar_lea.hbm %s797_s1, %s509_s23 }
   0xe   : > { %s159_s28 = sshll.u32 %s158_s27, 4  ;;  %s150_s29 = scalar_lea.vmem [#allocation3], %s496_s24  ;;  %s160_s28 = int_to_ptr.hbm [resolvable:$true] %s159_s28 }
   0xf   : > { %s161_s30 = sshll.u32 %s150_s29, 4  ;;  %p513_p9 = pnand %p516_p8, %p704_p3  ;;  %s162_s30 = int_to_ptr.vmem [resolvable:$true] %s161_s30 }
  0x10   : > { %p499_p10 = scmp.ge.s32.totalorder %s648_s14, 1  ;;  %s147_s3 = scalar_lea.sflag [#allocation4], %s146_s22 }
  0x11   : > { %s650_s4 = smov 1024   ;;  %s651_s5 = smov 512  }
  0x12   : > { %s652_s6 = smov 32   ;;  %p169_p11 = scmp.lt.s32.totalorder %s648_s14, 3 }
  0x13   : > { %515 = dma.hbm_to_vmem [thread:$0]  (!%p513_p9), %s160_s28, 4096, %s162_s30, %s147_s3, %s650_s4, %s651_s5, %s652_s6  }
  0x14   : > { %p170_p12 = pnand %p499_p10, %p169_p11 }
  0x15   : > { %s175_s7 = sand.u32 (!%p170_p12), 1, %s632_s10  }
  0x16   : > { %173 = sbr.rel (%p170_p12) target bundleno = 181 (0xb5), region = 28  ;;  %s500_s8 = sshll.u32 (!%p170_p12), %s175_s7, 8 }
  0x17   : > { %s176_s9 = scalar_lea.sflag (!%p170_p12), [#allocation4], %s175_s7  ;;  %s729_s15 = scalar_lea.vmem (!%p170_p12), [#allocation3], %s500_s8 }
  0x1b   : > { %623 = dma.done.wait (%p711_p7), %s176_s9, 4096  }
  0x1c   : > { %625 = vsyncadd (%p711_p7), %s176_s9, 4294963200  ;;  %v268_v0 = vld [vmem:[%s729_s15 + $0xf0] sm:$0xff]  ;;  %v269_v1 = vld [vmem:[%s729_s15 + $0xf8] sm:$0xff]  ;;  %vm270_vm0 = vcmask 523264   ;;  %s501_s19 = sshll.u32 %s640_s12, 2  ;;  %vm361_vm1 = vcmask 1041408  }
  0x1d   : > { %v264_v2 = vld [vmem:[%s729_s15 + $0xd0] sm:$0xff]  ;;  %322 = vmatpush.msra.mxu2 %v268_v0  ;;  %342 = vmatpush.msra.mxu3 %v269_v1  ;;  %v265_v3 = vld [vmem:[%s729_s15 + $0xd8] sm:$0xff]  ;;  %v267_v6 = vld [vmem:[%s729_s15 + $0xe8] sm:$0xff]  ;;  %p224_p13 = scmp.lt.s32.totalorder %s501_s19, 7  ;;  %vm363_vm2 = vcmask 1045508   ;;  %vm365_vm3 = vcmask 1043456  }
  0x1e   : > { %v260_v4 = vld [vmem:[%s729_s15 + $0xb0] sm:$0xff]  ;;  %v261_v5 = vld [vmem:[%s729_s15 + $0xb8] sm:$0xff]  ;;  %v266_v7 = vld [vmem:[%s729_s15 + $0xe0] sm:$0xff]  ;;  %302 = vmatpush.msra.mxu1 %v267_v6 }
  0x1f   : > { %323 = vmatpush.msra.mxu2 %v264_v2  ;;  %343 = vmatpush.msra.mxu3 %v265_v3  ;;  %v263_v8 = vld [vmem:[%s729_s15 + $0xc8] sm:$0xff]  ;;  %v256_v9 = vld [vmem:[%s729_s15 + $0x90] sm:$0xff]  ;;  %v257_v10 = vld [vmem:[%s729_s15 + $0x98] sm:$0xff]  ;;  %s809_s19 = smov (!%p224_p13, %s501_s19), 7 }
  0x20   : > { %282 = vmatpush.msra.mxu0 %v266_v7  ;;  %v262_v11 = vld [vmem:[%s729_s15 + $0xc0] sm:$0xff]  ;;  %v259_v12 = vld [vmem:[%s729_s15 + $0xa8] sm:$0xff]  ;;  %303 = vmatpush.msra.mxu1 %v263_v8  ;;  %v252_v14 = vld [vmem:[%s729_s15 + $0x70] sm:$0xff]  ;;  %s502_s20 = sshll.u32 %s809_s19, 1 }
  0x21   : > { %324 = vmatpush.msra.mxu2 %v260_v4  ;;  %344 = vmatpush.msra.mxu3 %v261_v5  ;;  %v258_v13 = vld [vmem:[%s729_s15 + $0xa0] sm:$0xff]  ;;  %v253_v15 = vld [vmem:[%s729_s15 + $0x78] sm:$0xff]  ;;  %v255_v16 = vld [vmem:[%s729_s15 + $0x88] sm:$0xff]  ;;  %s229_s24 = scalar_lea.vmem %s798_s2, %s502_s20 }
  0x22   : > { %283 = vmatpush.msra.mxu0 %v262_v11  ;;  %v254_v17 = vld [vmem:[%s729_s15 + $0x80] sm:$0xff]  ;;  %304 = vmatpush.msra.mxu1 %v259_v12  ;;  %v248_v18 = vld [vmem:[%s729_s15 + $0x50] sm:$0xff]  ;;  %v249_v19 = vld [vmem:[%s729_s15 + $0x58] sm:$0xff] }
  0x23   : > { %325 = vmatpush.msra.mxu2 %v256_v9  ;;  %345 = vmatpush.msra.mxu3 %v257_v10  ;;  %v251_v20 = vld [vmem:[%s729_s15 + $0x68] sm:$0xff]  ;;  %v250_v21 = vld [vmem:[%s729_s15 + $0x60] sm:$0xff]  ;;  %v244_v22 = vld [vmem:[%s729_s15 + $0x30] sm:$0xff] }
  0x24   : > { %284 = vmatpush.msra.mxu0 %v258_v13  ;;  %305 = vmatpush.msra.mxu1 %v255_v16  ;;  %v245_v23 = vld [vmem:[%s729_s15 + $0x38] sm:$0xff]  ;;  %v247_v24 = vld [vmem:[%s729_s15 + $0x48] sm:$0xff]  ;;  %v246_v25 = vld [vmem:[%s729_s15 + $0x40] sm:$0xff] }
  0x25   : > { %326 = vmatpush.msra.mxu2 %v252_v14  ;;  %346 = vmatpush.msra.mxu3 %v253_v15  ;;  %v240_v26 = vld [vmem:[%s729_s15 + $0x10] sm:$0xff]  ;;  %v241_v27 = vld [vmem:[%s729_s15 + $0x18] sm:$0xff]  ;;  %v237_v28 = vld [vmem:[%s796_s0] sm:$0x3] }
  0x26   : > { %285 = vmatpush.msra.mxu0 %v254_v17  ;;  %306 = vmatpush.msra.mxu1 %v251_v20  ;;  %v243_v29 = vld [vmem:[%s729_s15 + $0x28] sm:$0xff]  ;;  %v242_v30 = vld [vmem:[%s729_s15 + $0x20] sm:$0xff] }
  0x27   : > { %327 = vmatpush.msra.mxu2 %v248_v18  ;;  %347 = vmatpush.msra.mxu3 %v249_v19  ;;  %v239_v31 = vld [vmem:[%s729_s15 + $0x8] sm:$0xff]  ;;  %v238_v32 = vld [vmem:[%s729_s15] sm:$0xff] }
  0x28   : > { %286 = vmatpush.msra.mxu0 %v250_v21  ;;  %307 = vmatpush.msra.mxu1 %v247_v24 }
  0x29   : > { %328 = vmatpush.msra.mxu2 %v244_v22  ;;  %348 = vmatpush.msra.mxu3 %v245_v23 }
  0x2a   : > { %287 = vmatpush.msra.mxu0 %v246_v25  ;;  %308 = vmatpush.msra.mxu1 %v243_v29 }
  0x2b   : > { %329 = vmatpush.msra.mxu2 %v240_v26  ;;  %349 = vmatpush.msra.mxu3 %v241_v27 }
  0x2c   : > { %505 = vmatmul.msk.f32.vlgmr.msra.gmra.mxu2 %vm270_vm0, %v237_v28  ;;  %506 = vmatmul.msk.f32.vlgmr.msra.gmra.mxu3 %vm270_vm0, %v237_v28 }
  0x2d   : > { %288 = vmatpush.msra.mxu0 %v242_v30  ;;  %309 = vmatpush.msra.mxu1 %v239_v31 }
  0x2e   : > { %504 = vmatmul.msk.f32.vlgmr.msra.gmra.mxu1 %vm270_vm0, %v237_v28 }
  0x2f   : > { %289 = vmatpush.msra.mxu0 %v238_v32 }
  0x30   : > { %503 = vmatmul.msk.f32.vlgmr.msra.gmra.mxu0 %vm270_vm0, %v237_v28 }
  0xab   : > { %v311_v33 = vpop.f32.mrf.mxu1 }
  0xac   : > { %v358_v35 = vrot.slane %v311_v33, 6 }
  0xad   : > { %v291_v34 = vpop.f32.mrf.mxu0 }
  0xae   : > { %v362_v40 = vsel %vm361_vm1, %v291_v34, %v358_v35 }
  0xaf   : > { %v331_v36 = vpop.f32.mrf.mxu2  ;;  %v351_v37 = vpop.f32.mrf.mxu3 }
  0xb0   : > { %v359_v38 = vrot.slane %v331_v36, 4  ;;  %v360_v39 = vrot.slane %v351_v37, 2 }
  0xb2   : > { %v364_v41 = vsel %vm363_vm2, %v359_v38, %v360_v39 }
  0xb3   : > { %v366_v42 = vsel %vm365_vm3, %v362_v40, %v364_v41 }
  0xb4   : > { %374 = vst [vmem:[%s229_s24] sm:$0xff] %v366_v42 }
  0xb5 PF: > { %s15_s14 = sadd.s32 1, %s648_s14   ;;  %s801_s9 = smov %s632_s10 }
  0xb6   : > { %p12_p0 = scmp.ge.s32.totalorder %s15_s14, 4   ;;  %s802_s10 = smov %s636_s11 }
  0xb7   : > { %s803_s11 = smov %s717_s21  ;;  %s804_s12 = smov %s644_s13 }
  0xb8   : > { %s805_s13 = smov %s807_s16  ;;  %14 = sbr.rel (!%p12_p0) target bundleno = 4 (0x4), region = 79 }
  0xbd   :  { %405 = vsyncpa [#allocation4], 1 }
  0xbe   :  { %407 = vsyncpa [#allocation4 + $0x1], 1 }

</bundles_post_ra>
